<compile_context>
chip_gen: v6e
topology: v6e:2x2x1
jax: 0.10.0
libtpu: 0.0.40
codegen_flags: <defaults>
</compile_context>

<pallas_src>
import jax
import jax.numpy as jnp
from jax.experimental import pallas as pl
from jax.experimental.pallas import tpu as pltpu


def _make_kernel(n_classes, tile_r, n_chunks, m_valid):
    """Build the kernel closed over static config.

    n_classes: number of class logits (C - 5)
    tile_r:    rows (of 128 lanes) per grid step, multiple of 8
    n_chunks:  tile_r // 8
    m_valid:   true (unpadded) number of cells per anchor
    """
    K = n_classes

    def kernel(pred_ref, tgt_ref, anc_ref, out_ref):
        a = pl.program_id(0)
        m = pl.program_id(1)

        # out_ref (6, 8, 128) is the per-anchor accumulator; it stays resident
        # in VMEM across the (innermost, "arbitrary") m axis.
        @pl.when(m == 0)
        def _():
            out_ref[...] = jnp.zeros_like(out_ref)

        # per-anchor constants from the SMEM table: [w, h, 1/w, 1/h]
        aw = anc_ref[a, 0]
        ah = anc_ref[a, 1]
        inv_aw = anc_ref[a, 2]
        inv_ah = anc_ref[a, 3]

        row_iota = jax.lax.broadcasted_iota(jnp.int32, (8, 128), 0)
        col_iota = jax.lax.broadcasted_iota(jnp.int32, (8, 128), 1)
        tile_base = m * tile_r

        @pl.loop(0, n_chunks)
        def _(c):
            r0 = pl.multiple_of(c * 8, 8)
            rows = pl.ds(r0, 8)

            # validity mask: excludes wrapper zero-padding from both masks
            gidx = (tile_base + r0 + row_iota) * 128 + col_iota
            valid = gidx < m_valid

            conf_t = tgt_ref[0, rows, :]                      # (8,128) f32
            obj_m = (conf_t == 1.0) & valid
            noobj_m = (conf_t == 0.0) & valid

            # ---- no-object BCEWithLogits (target 0) = softplus(x), stable ---
            x = pred_ref[0, rows, :].astype(jnp.float32)
            bce = jnp.maximum(x, 0.0) + jnp.log1p(jnp.exp(-jnp.abs(x)))
            out_ref[0, :, :] += jnp.where(noobj_m, bce, 0.0)
            out_ref[1, :, :] += noobj_m.astype(jnp.float32)
            out_ref[3, :, :] += obj_m.astype(jnp.float32)

            n_obj_chunk = jnp.sum(obj_m.astype(jnp.float32))

            # ---- obj-only heavy math, skipped for empty chunks --------------
            @pl.when(n_obj_chunk > 0.0)
            def _():
                sig_conf = jax.nn.sigmoid(x)

                px = pred_ref[1, rows, :].astype(jnp.float32)
                py = pred_ref[2, rows, :].astype(jnp.float32)
                pw = pred_ref[3, rows, :].astype(jnp.float32)
                ph = pred_ref[4, rows, :].astype(jnp.float32)
                sig_x = jax.nn.sigmoid(px)
                sig_y = jax.nn.sigmoid(py)
                bw = jnp.exp(pw) * aw
                bh = jnp.exp(ph) * ah

                tx = tgt_ref[1, rows, :]
                ty = tgt_ref[2, rows, :]
                tw = tgt_ref[3, rows, :]
                th = tgt_ref[4, rows, :]

                # fused midpoint IoU (no corner temporaries)
                hbw = 0.5 * bw
                hbh = 0.5 * bh
                htw = 0.5 * tw
                hth = 0.5 * th
                iw = jnp.maximum(
                    jnp.minimum(sig_x + hbw, tx + htw)
                    - jnp.maximum(sig_x - hbw, tx - htw), 0.0)
                ih = jnp.maximum(
                    jnp.minimum(sig_y + hbh, ty + hth)
                    - jnp.maximum(sig_y - hbh, ty - hth), 0.0)
                inter = iw * ih
                union = jnp.abs(bw * bh) + jnp.abs(tw * th) - inter + 1e-6
                iou = inter * pl.reciprocal(union, approx=True)

                # object loss: (sigmoid(conf) - iou)^2 on obj cells
                od = sig_conf - iou
                out_ref[2, :, :] += jnp.where(obj_m, od * od, 0.0)

                # box loss: SE over [sig_x, sig_y, w, h] vs transformed target
                dx = sig_x - tx
                dy = sig_y - ty
                dw = pw - jnp.log(1e-16 + tw * inv_aw)
                dh = ph - jnp.log(1e-16 + th * inv_ah)
                out_ref[4, :, :] += jnp.where(
                    obj_m, dx * dx + dy * dy + dw * dw + dh * dh, 0.0)

                # class cross-entropy: two streamed passes over K logit rows
                labels = tgt_ref[5, rows, :].astype(jnp.int32)
                mx = pred_ref[5, rows, :].astype(jnp.float32)
                for k in range(1, K):
                    mx = jnp.maximum(
                        mx, pred_ref[5 + k, rows, :].astype(jnp.float32))
                se = jnp.zeros((8, 128), jnp.float32)
                picked = jnp.zeros((8, 128), jnp.float32)
                for k in range(K):
                    lk = pred_ref[5 + k, rows, :].astype(jnp.float32)
                    se += jnp.exp(lk - mx)
                    picked += jnp.where(labels == k, lk, 0.0)
                ce = mx + jnp.log(se) - picked
                out_ref[5, :, :] += jnp.where(obj_m, ce, 0.0)

    return kernel


def yolo_loss(predictions, target, anchors, *, tile_rows=64):
    """predictions: (N, 3, S, S, 5+NC); target: (N, 3, S, S, 6); anchors: (3, 2)."""
    N, A, S, S2, C = predictions.shape
    assert S == S2 and C >= 6 and anchors.shape == (A, 2)
    n_classes = C - 5
    Mp = N * S * S                                  # cells per anchor

    # rows of 128 lanes; tile_r rows per grid step (multiple of 8)
    R = (Mp + 127) // 128
    tile_r = min(int(tile_rows), ((R + 7) // 8) * 8)
    tile_r = max(8, ((tile_r + 7) // 8) * 8)
    n_tiles = (R + tile_r - 1) // tile_r
    r_pad = n_tiles * tile_r
    mp_pad = r_pad * 128

    # channel-major / anchor-major relayout: (N,A,S,S,C) -> (A, C, M)
    # TODO(synk): this transpose is a separate XLA copy of both tensors; emit the
    # detection head channel-major (or DMA-relayout in-kernel) to remove it.
    pred_t = jnp.transpose(predictions, (1, 4, 0, 2, 3)).reshape(A, C, Mp)
    tgt_t = jnp.transpose(target.astype(jnp.float32),
                          (1, 4, 0, 2, 3)).reshape(A, 6, Mp)

    pad = mp_pad - Mp
    if pad:
        # zero pad; padded cells are excluded in-kernel by the validity mask
        pred_t = jnp.pad(pred_t, ((0, 0), (0, 0), (0, pad)))
        tgt_t = jnp.pad(tgt_t, ((0, 0), (0, 0), (0, pad)))
    pred_t = pred_t.reshape(A, C, r_pad, 128)
    tgt_t = tgt_t.reshape(A, 6, r_pad, 128)

    anc = anchors.astype(jnp.float32).reshape(A, 2)
    anc_tab = jnp.concatenate([anc, 1.0 / anc], axis=1)    # (A,4): [w,h,1/w,1/h]

    kernel = _make_kernel(n_classes, tile_r, tile_r // 8, Mp)

    partials = pl.pallas_call(
        kernel,
        out_shape=jax.ShapeDtypeStruct((A, 6, 8, 128), jnp.float32),
        grid=(A, n_tiles),
        in_specs=[
            pl.BlockSpec((None, C, tile_r, 128), lambda a, m: (a, 0, m, 0)),
            pl.BlockSpec((None, 6, tile_r, 128), lambda a, m: (a, 0, m, 0)),
            pl.BlockSpec(memory_space=pltpu.MemorySpace.SMEM),
        ],
        out_specs=pl.BlockSpec((None, 6, 8, 128), lambda a, m: (a, 0, 0, 0)),
        compiler_params=pltpu.CompilerParams(
            dimension_semantics=("parallel", "arbitrary")),
    )(pred_t, tgt_t, anc_tab)

    # single final reduction + weighting in the wrapper
    s = jnp.sum(partials, axis=(0, 2, 3))           # (6,)
    n_noobj = jnp.maximum(s[1], 1.0)
    n_obj = jnp.maximum(s[3], 1.0)
    no_object_loss = s[0] / n_noobj
    object_loss = s[2] / n_obj
    box_loss = s[4] / jnp.maximum(4.0 * s[3], 1.0)
    class_loss = s[5] / n_obj

    return (10.0 * box_loss + 1.0 * object_loss
            + 10.0 * no_object_loss + 1.0 * class_loss)


def yolo_loss_ref(predictions, target, anchors):
    """Pure-JAX reference with PyTorch-matching masked-mean semantics."""
    N, A, S, _, C = predictions.shape
    M = N * A * S * S
    pred = predictions.reshape(M, C).astype(jnp.float32)
    tgt = target.reshape(M, 6).astype(jnp.float32)
    anc = jnp.broadcast_to(
        anchors.reshape(1, A, 1, 1, 2), (N, A, S, S, 2)
    ).reshape(M, 2).astype(jnp.float32)

    t_conf = tgt[:, 0:1]
    obj = t_conf == 1.0
    noobj = t_conf == 0.0
    n_obj = jnp.sum(obj.astype(jnp.float32))
    n_noobj = jnp.sum(noobj.astype(jnp.float32))

    x = pred[:, 0:1]
    bce = jnp.maximum(x, 0.0) - x * t_conf + jnp.log1p(jnp.exp(-jnp.abs(x)))
    no_object_loss = jnp.sum(jnp.where(noobj, bce, 0.0)) / jnp.maximum(n_noobj, 1.0)

    sig_xy = jax.nn.sigmoid(pred[:, 1:3])
    exp_wh = jnp.exp(pred[:, 3:5]) * anc
    b1x1 = sig_xy[:, 0:1] - exp_wh[:, 0:1] * 0.5
    b1y1 = sig_xy[:, 1:2] - exp_wh[:, 1:2] * 0.5
    b1x2 = sig_xy[:, 0:1] + exp_wh[:, 0:1] * 0.5
    b1y2 = sig_xy[:, 1:2] + exp_wh[:, 1:2] * 0.5
    b2x1 = tgt[:, 1:2] - tgt[:, 3:4] * 0.5
    b2y1 = tgt[:, 2:3] - tgt[:, 4:5] * 0.5
    b2x2 = tgt[:, 1:2] + tgt[:, 3:4] * 0.5
    b2y2 = tgt[:, 2:3] + tgt[:, 4:5] * 0.5
    inter = (jnp.maximum(jnp.minimum(b1x2, b2x2) - jnp.maximum(b1x1, b2x1), 0.0)
             * jnp.maximum(jnp.minimum(b1y2, b2y2) - jnp.maximum(b1y1, b2y1), 0.0))
    a1 = jnp.abs((b1x2 - b1x1) * (b1y2 - b1y1))
    a2 = jnp.abs((b2x2 - b2x1) * (b2y2 - b2y1))
    iou = inter / (a1 + a2 - inter + 1e-6)

    sig_conf = jax.nn.sigmoid(x)
    od = sig_conf - iou * t_conf
    object_loss = jnp.sum(jnp.where(obj, od * od, 0.0)) / jnp.maximum(n_obj, 1.0)

    t_wh_log = jnp.log(1e-16 + tgt[:, 3:5] / anc)
    d_xy = sig_xy - tgt[:, 1:3]
    d_wh = pred[:, 3:5] - t_wh_log
    se = jnp.sum(d_xy * d_xy + d_wh * d_wh, axis=1, keepdims=True)
    box_loss = jnp.sum(jnp.where(obj, se, 0.0)) / jnp.maximum(4.0 * n_obj, 1.0)

    logits = pred[:, 5:]
    m = jnp.max(logits, axis=1, keepdims=True)
    lse = m + jnp.log(jnp.sum(jnp.exp(logits - m), axis=1, keepdims=True))
    labels = tgt[:, 5:6].astype(jnp.int32)
    col = jax.lax.broadcasted_iota(jnp.int32, logits.shape, 1)
    picked = jnp.sum(jnp.where(col == labels, logits, 0.0), axis=1, keepdims=True)
    ce = lse - picked
    class_loss = jnp.sum(jnp.where(obj, ce, 0.0)) / jnp.maximum(n_obj, 1.0)

    return (10.0 * box_loss + object_loss + 10.0 * no_object_loss + class_loss)


if __name__ == "__main__":
    N, A, S, NC = 2, 3, 8, 4            # batch, anchors-per-scale, grid, classes
    C = 5 + NC

    key = jax.random.PRNGKey(0)
    k1, k2, k3, k4, k5 = jax.random.split(key, 5)

    predictions = 0.5 * jax.random.normal(k1, (N, A, S, S, C), jnp.float32)
    # conf target in {1 (obj), 0 (noobj), -1 (ignore)}
    conf = jax.random.choice(k2, jnp.array([1.0, 0.0, 0.0, -1.0], jnp.float32),
                             (N, A, S, S, 1))
    xy = jax.random.uniform(k3, (N, A, S, S, 2), minval=0.05, maxval=0.95)
    wh = jax.random.uniform(k4, (N, A, S, S, 2), minval=0.1, maxval=2.0)
    cls = jax.random.randint(k5, (N, A, S, S, 1), 0, NC).astype(jnp.float32)
    target = jnp.concatenate([conf, xy, wh, cls], axis=-1)

    anchors = jnp.array([[0.28, 0.22], [0.38, 0.48], [0.90, 0.78]], jnp.float32)

    loss = jax.block_until_ready(yolo_loss(predictions, target, anchors))
    ref = jax.block_until_ready(yolo_loss_ref(predictions, target, anchors))

    assert jnp.isfinite(loss), f"kernel produced non-finite loss: {loss}"
    assert jnp.allclose(loss, ref, rtol=2e-3, atol=2e-3), (loss, ref)
    print("KERNEL_OK")
</pallas_src>

<mosaic_0001>
module attributes {stable_mosaic.version = 11 : i64} {
  func.func @kernel(%arg0: i32, %arg1: i32, %arg2: memref<1x9x8x128xf32, #tpu.memory_space<vmem>>, %arg3: memref<1x6x8x128xf32, #tpu.memory_space<vmem>>, %arg4: memref<3x4xf32, #tpu.memory_space<smem>>, %arg5: memref<1x6x8x128xf32, #tpu.memory_space<vmem>>) attributes {dimension_semantics = [#tpu.dimension_semantics<parallel>, #tpu.dimension_semantics<arbitrary>], iteration_bounds = array<i64: 3, 1>, scalar_prefetch = 0 : i64, scratch_operands = 0 : i64, tpu.core_type = #tpu.core_type<tc>, window_params = [{transform_indices = @transform_0, window_bounds = array<i64: 1, 9, 8, 128>}, {transform_indices = @transform_1, window_bounds = array<i64: 1, 6, 8, 128>}, {transform_indices = @transform_2, window_bounds = array<i64: 3, 4>}, {transform_indices = @transform_3, window_bounds = array<i64: 1, 6, 8, 128>}]} {
    %c0_i32 = arith.constant 0 : i32
    %0 = arith.cmpi eq, %arg1, %c0_i32 : i32
    %1 = arith.extui %0 : i1 to i32
    %c0_i32_0 = arith.constant 0 : i32
    %2 = arith.cmpi ne, %1, %c0_i32_0 : i32
    scf.if %2 {
      %cst_43 = arith.constant 0.000000e+00 : f32
      %79 = vector.broadcast %cst_43 : f32 to vector<6x8x128xf32>
      %c0_44 = arith.constant 0 : index
      %c0_45 = arith.constant 0 : index
      %c0_46 = arith.constant 0 : index
      %c0_47 = arith.constant 0 : index
      %80 = vector.load %arg5[%c0_44, %c0_45, %c0_46, %c0_47] : memref<1x6x8x128xf32, #tpu.memory_space<vmem>>, vector<1x6x8x128xf32>
      %81 = vector.shape_cast %80 : vector<1x6x8x128xf32> to vector<6x8x128xf32>
      %82 = vector.shape_cast %79 : vector<6x8x128xf32> to vector<1x6x8x128xf32>
      tpu.vector_store %arg5[%c0_44, %c0_45, %c0_46, %c0_47], %82 {strides = array<i32>} : memref<1x6x8x128xf32, #tpu.memory_space<vmem>>, vector<1x6x8x128xf32>,
    } else {
    }
    %3 = arith.index_cast %arg0 : i32 to index
    %c0 = arith.constant 0 : index
    %4 = memref.load %arg4[%3, %c0] : memref<3x4xf32, #tpu.memory_space<smem>>
    %5 = arith.index_cast %arg0 : i32 to index
    %c1 = arith.constant 1 : index
    %6 = memref.load %arg4[%5, %c1] : memref<3x4xf32, #tpu.memory_space<smem>>
    %7 = arith.index_cast %arg0 : i32 to index
    %c2 = arith.constant 2 : index
    %8 = memref.load %arg4[%7, %c2] : memref<3x4xf32, #tpu.memory_space<smem>>
    %9 = arith.index_cast %arg0 : i32 to index
    %c3 = arith.constant 3 : index
    %10 = memref.load %arg4[%9, %c3] : memref<3x4xf32, #tpu.memory_space<smem>>
    %11 = tpu.iota {dimensions = array<i32: 0>} : vector<8x128xi32>
    %12 = tpu.iota {dimensions = array<i32: 1>} : vector<8x128xi32>
    %c8_i32 = arith.constant 8 : i32
    %13 = arith.muli %arg1, %c8_i32 : i32
    %c0_i32_1 = arith.constant 0 : i32
    %c1_i32 = arith.constant 1 : i32
    %14 = arith.muli %c0_i32_1, %c1_i32 : i32
    %c0_i32_2 = arith.constant 0 : i32
    %15 = arith.addi %c0_i32_2, %14 : i32
    %c8_i32_3 = arith.constant 8 : i32
    %16 = arith.muli %15, %c8_i32_3 : i32
    %17 = tpu.assume_multiple %16, 8 : i32
    %18 = arith.addi %13, %17 : i32
    %19 = vector.broadcast %18 : i32 to vector<8x128xi32>
    %20 = arith.addi %19, %11 : vector<8x128xi32>
    %c128_i32 = arith.constant 128 : i32
    %21 = vector.broadcast %c128_i32 : i32 to vector<8x128xi32>
    %22 = arith.muli %20, %21 : vector<8x128xi32>
    %23 = arith.addi %22, %12 : vector<8x128xi32>
    %c128_i32_4 = arith.constant 128 : i32
    %24 = vector.broadcast %c128_i32_4 : i32 to vector<8x128xi32>
    %25 = arith.cmpi slt, %23, %24 : vector<8x128xi32>
    %c0_5 = arith.constant 0 : index
    %c0_6 = arith.constant 0 : index
    %26 = arith.index_cast %17 : i32 to index
    %c0_7 = arith.constant 0 : index
    %27 = vector.load %arg3[%c0_5, %c0_6, %26, %c0_7] : memref<1x6x8x128xf32, #tpu.memory_space<vmem>>, vector<1x1x8x128xf32>
    %28 = vector.shape_cast %27 : vector<1x1x8x128xf32> to vector<8x128xf32>
    %cst = arith.constant 1.000000e+00 : f32
    %29 = vector.broadcast %cst : f32 to vector<8x128xf32>
    %30 = arith.cmpf oeq, %28, %29 : vector<8x128xf32>
    %31 = arith.andi %30, %25 : vector<8x128xi1>
    %cst_8 = arith.constant 0.000000e+00 : f32
    %32 = vector.broadcast %cst_8 : f32 to vector<8x128xf32>
    %33 = arith.cmpf oeq, %28, %32 : vector<8x128xf32>
    %34 = arith.andi %33, %25 : vector<8x128xi1>
    %c0_9 = arith.constant 0 : index
    %c0_10 = arith.constant 0 : index
    %35 = arith.index_cast %17 : i32 to index
    %c0_11 = arith.constant 0 : index
    %36 = vector.load %arg2[%c0_9, %c0_10, %35, %c0_11] : memref<1x9x8x128xf32, #tpu.memory_space<vmem>>, vector<1x1x8x128xf32>
    %37 = vector.shape_cast %36 : vector<1x1x8x128xf32> to vector<8x128xf32>
    %cst_12 = arith.constant 0.000000e+00 : f32
    %38 = vector.broadcast %cst_12 : f32 to vector<8x128xf32>
    %39 = arith.maximumf %37, %38 : vector<8x128xf32>
    %40 = math.absf %37 : vector<8x128xf32>
    %cst_13 = arith.constant 0.000000e+00 : f32
    %41 = vector.broadcast %cst_13 : f32 to vector<8x128xf32>
    %42 = arith.subf %41, %40 : vector<8x128xf32>
    %43 = math.exp %42 : vector<8x128xf32>
    %44 = math.log1p %43 : vector<8x128xf32>
    %45 = arith.addf %39, %44 : vector<8x128xf32>
    %c0_14 = arith.constant 0 : index
    %c0_15 = arith.constant 0 : index
    %c0_16 = arith.constant 0 : index
    %c0_17 = arith.constant 0 : index
    %46 = vector.load %arg5[%c0_14, %c0_15, %c0_16, %c0_17] : memref<1x6x8x128xf32, #tpu.memory_space<vmem>>, vector<1x1x8x128xf32>
    %47 = vector.shape_cast %46 : vector<1x1x8x128xf32> to vector<8x128xf32>
    %cst_18 = arith.constant 0.000000e+00 : f32
    %48 = vector.broadcast %cst_18 : f32 to vector<8x128xf32>
    %49 = arith.select %34, %45, %48 : vector<8x128xi1>, vector<8x128xf32>
    %50 = arith.addf %47, %49 : vector<8x128xf32>
    %c0_19 = arith.constant 0 : index
    %c0_20 = arith.constant 0 : index
    %c0_21 = arith.constant 0 : index
    %c0_22 = arith.constant 0 : index
    %51 = vector.load %arg5[%c0_19, %c0_20, %c0_21, %c0_22] : memref<1x6x8x128xf32, #tpu.memory_space<vmem>>, vector<1x1x8x128xf32>
    %52 = vector.shape_cast %51 : vector<1x1x8x128xf32> to vector<8x128xf32>
    %53 = vector.shape_cast %50 : vector<8x128xf32> to vector<1x1x8x128xf32>
    tpu.vector_store %arg5[%c0_19, %c0_20, %c0_21, %c0_22], %53 {strides = array<i32>} : memref<1x6x8x128xf32, #tpu.memory_space<vmem>>, vector<1x1x8x128xf32>,
    %c0_23 = arith.constant 0 : index
    %c1_24 = arith.constant 1 : index
    %c0_25 = arith.constant 0 : index
    %c0_26 = arith.constant 0 : index
    %54 = vector.load %arg5[%c0_23, %c1_24, %c0_25, %c0_26] : memref<1x6x8x128xf32, #tpu.memory_space<vmem>>, vector<1x1x8x128xf32>
    %55 = vector.shape_cast %54 : vector<1x1x8x128xf32> to vector<8x128xf32>
    %56 = arith.extui %34 : vector<8x128xi1> to vector<8x128xi32>
    %57 = arith.sitofp %56 : vector<8x128xi32> to vector<8x128xf32>
    %58 = arith.addf %55, %57 : vector<8x128xf32>
    %c0_27 = arith.constant 0 : index
    %c1_28 = arith.constant 1 : index
    %c0_29 = arith.constant 0 : index
    %c0_30 = arith.constant 0 : index
    %59 = vector.load %arg5[%c0_27, %c1_28, %c0_29, %c0_30] : memref<1x6x8x128xf32, #tpu.memory_space<vmem>>, vector<1x1x8x128xf32>
    %60 = vector.shape_cast %59 : vector<1x1x8x128xf32> to vector<8x128xf32>
    %61 = vector.shape_cast %58 : vector<8x128xf32> to vector<1x1x8x128xf32>
    tpu.vector_store %arg5[%c0_27, %c1_28, %c0_29, %c0_30], %61 {strides = array<i32>} : memref<1x6x8x128xf32, #tpu.memory_space<vmem>>, vector<1x1x8x128xf32>,
    %c0_31 = arith.constant 0 : index
    %c3_32 = arith.constant 3 : index
    %c0_33 = arith.constant 0 : index
    %c0_34 = arith.constant 0 : index
    %62 = vector.load %arg5[%c0_31, %c3_32, %c0_33, %c0_34] : memref<1x6x8x128xf32, #tpu.memory_space<vmem>>, vector<1x1x8x128xf32>
    %63 = vector.shape_cast %62 : vector<1x1x8x128xf32> to vector<8x128xf32>
    %64 = arith.extui %31 : vector<8x128xi1> to vector<8x128xi32>
    %65 = arith.sitofp %64 : vector<8x128xi32> to vector<8x128xf32>
    %66 = arith.addf %63, %65 : vector<8x128xf32>
    %c0_35 = arith.constant 0 : index
    %c3_36 = arith.constant 3 : index
    %c0_37 = arith.constant 0 : index
    %c0_38 = arith.constant 0 : index
    %67 = vector.load %arg5[%c0_35, %c3_36, %c0_37, %c0_38] : memref<1x6x8x128xf32, #tpu.memory_space<vmem>>, vector<1x1x8x128xf32>
    %68 = vector.shape_cast %67 : vector<1x1x8x128xf32> to vector<8x128xf32>
    %69 = vector.shape_cast %66 : vector<8x128xf32> to vector<1x1x8x128xf32>
    tpu.vector_store %arg5[%c0_35, %c3_36, %c0_37, %c0_38], %69 {strides = array<i32>} : memref<1x6x8x128xf32, #tpu.memory_space<vmem>>, vector<1x1x8x128xf32>,
    %70 = arith.extui %31 : vector<8x128xi1> to vector<8x128xi32>
    %71 = arith.sitofp %70 : vector<8x128xi32> to vector<8x128xf32>
    %72 = vector.shape_cast %71 : vector<8x128xf32> to vector<1x8x128xf32>
    %cst_39 = arith.constant dense<0.000000e+00> : vector<1xf32>
    %73 = vector.multi_reduction <add>, %72, %cst_39 [1, 2] : vector<1x8x128xf32> to vector<1xf32>
    %74 = vector.shape_cast %73 : vector<1xf32> to vector<1x1x1xf32>
    %75 = vector.extract %74[0, 0, 0] : f32 from vector<1x1x1xf32>
    %cst_40 = arith.constant 0.000000e+00 : f32
    %76 = arith.cmpf ogt, %75, %cst_40 : f32
    %77 = arith.extui %76 : i1 to i32
    %c0_i32_41 = arith.constant 0 : i32
    %78 = arith.cmpi ne, %77, %c0_i32_41 : i32
    scf.if %78 {
      %79 = arith.negf %37 : vector<8x128xf32>
      %80 = math.exp %79 : vector<8x128xf32>
      %cst_43 = arith.constant 1.000000e+00 : f32
      %81 = vector.broadcast %cst_43 : f32 to vector<8x128xf32>
      %82 = arith.addf %81, %80 : vector<8x128xf32>
      %83 = arith.divf %81, %82 : vector<8x128xf32>
      %c0_44 = arith.constant 0 : index
      %c1_45 = arith.constant 1 : index
      %84 = arith.index_cast %17 : i32 to index
      %c0_46 = arith.constant 0 : index
      %85 = vector.load %arg2[%c0_44, %c1_45, %84, %c0_46] : memref<1x9x8x128xf32, #tpu.memory_space<vmem>>, vector<1x1x8x128xf32>
      %86 = vector.shape_cast %85 : vector<1x1x8x128xf32> to vector<8x128xf32>
      %c0_47 = arith.constant 0 : index
      %c2_48 = arith.constant 2 : index
      %87 = arith.index_cast %17 : i32 to index
      %c0_49 = arith.constant 0 : index
      %88 = vector.load %arg2[%c0_47, %c2_48, %87, %c0_49] : memref<1x9x8x128xf32, #tpu.memory_space<vmem>>, vector<1x1x8x128xf32>
      %89 = vector.shape_cast %88 : vector<1x1x8x128xf32> to vector<8x128xf32>
      %c0_50 = arith.constant 0 : index
      %c3_51 = arith.constant 3 : index
      %90 = arith.index_cast %17 : i32 to index
      %c0_52 = arith.constant 0 : index
      %91 = vector.load %arg2[%c0_50, %c3_51, %90, %c0_52] : memref<1x9x8x128xf32, #tpu.memory_space<vmem>>, vector<1x1x8x128xf32>
      %92 = vector.shape_cast %91 : vector<1x1x8x128xf32> to vector<8x128xf32>
      %c0_53 = arith.constant 0 : index
      %c4 = arith.constant 4 : index
      %93 = arith.index_cast %17 : i32 to index
      %c0_54 = arith.constant 0 : index
      %94 = vector.load %arg2[%c0_53, %c4, %93, %c0_54] : memref<1x9x8x128xf32, #tpu.memory_space<vmem>>, vector<1x1x8x128xf32>
      %95 = vector.shape_cast %94 : vector<1x1x8x128xf32> to vector<8x128xf32>
      %96 = arith.negf %86 : vector<8x128xf32>
      %97 = math.exp %96 : vector<8x128xf32>
      %cst_55 = arith.constant 1.000000e+00 : f32
      %98 = vector.broadcast %cst_55 : f32 to vector<8x128xf32>
      %99 = arith.addf %98, %97 : vector<8x128xf32>
      %100 = arith.divf %98, %99 : vector<8x128xf32>
      %101 = arith.negf %89 : vector<8x128xf32>
      %102 = math.exp %101 : vector<8x128xf32>
      %cst_56 = arith.constant 1.000000e+00 : f32
      %103 = vector.broadcast %cst_56 : f32 to vector<8x128xf32>
      %104 = arith.addf %103, %102 : vector<8x128xf32>
      %105 = arith.divf %103, %104 : vector<8x128xf32>
      %106 = math.exp %92 : vector<8x128xf32>
      %107 = vector.broadcast %4 : f32 to vector<8x128xf32>
      %108 = arith.mulf %106, %107 : vector<8x128xf32>
      %109 = math.exp %95 : vector<8x128xf32>
      %110 = vector.broadcast %6 : f32 to vector<8x128xf32>
      %111 = arith.mulf %109, %110 : vector<8x128xf32>
      %c0_57 = arith.constant 0 : index
      %c1_58 = arith.constant 1 : index
      %112 = arith.index_cast %17 : i32 to index
      %c0_59 = arith.constant 0 : index
      %113 = vector.load %arg3[%c0_57, %c1_58, %112, %c0_59] : memref<1x6x8x128xf32, #tpu.memory_space<vmem>>, vector<1x1x8x128xf32>
      %114 = vector.shape_cast %113 : vector<1x1x8x128xf32> to vector<8x128xf32>
      %c0_60 = arith.constant 0 : index
      %c2_61 = arith.constant 2 : index
      %115 = arith.index_cast %17 : i32 to index
      %c0_62 = arith.constant 0 : index
      %116 = vector.load %arg3[%c0_60, %c2_61, %115, %c0_62] : memref<1x6x8x128xf32, #tpu.memory_space<vmem>>, vector<1x1x8x128xf32>
      %117 = vector.shape_cast %116 : vector<1x1x8x128xf32> to vector<8x128xf32>
      %c0_63 = arith.constant 0 : index
      %c3_64 = arith.constant 3 : index
      %118 = arith.index_cast %17 : i32 to index
      %c0_65 = arith.constant 0 : index
      %119 = vector.load %arg3[%c0_63, %c3_64, %118, %c0_65] : memref<1x6x8x128xf32, #tpu.memory_space<vmem>>, vector<1x1x8x128xf32>
      %120 = vector.shape_cast %119 : vector<1x1x8x128xf32> to vector<8x128xf32>
      %c0_66 = arith.constant 0 : index
      %c4_67 = arith.constant 4 : index
      %121 = arith.index_cast %17 : i32 to index
      %c0_68 = arith.constant 0 : index
      %122 = vector.load %arg3[%c0_66, %c4_67, %121, %c0_68] : memref<1x6x8x128xf32, #tpu.memory_space<vmem>>, vector<1x1x8x128xf32>
      %123 = vector.shape_cast %122 : vector<1x1x8x128xf32> to vector<8x128xf32>
      %cst_69 = arith.constant 5.000000e-01 : f32
      %124 = vector.broadcast %cst_69 : f32 to vector<8x128xf32>
      %125 = arith.mulf %124, %108 : vector<8x128xf32>
      %cst_70 = arith.constant 5.000000e-01 : f32
      %126 = vector.broadcast %cst_70 : f32 to vector<8x128xf32>
      %127 = arith.mulf %126, %111 : vector<8x128xf32>
      %cst_71 = arith.constant 5.000000e-01 : f32
      %128 = vector.broadcast %cst_71 : f32 to vector<8x128xf32>
      %129 = arith.mulf %128, %120 : vector<8x128xf32>
      %cst_72 = arith.constant 5.000000e-01 : f32
      %130 = vector.broadcast %cst_72 : f32 to vector<8x128xf32>
      %131 = arith.mulf %130, %123 : vector<8x128xf32>
      %132 = arith.addf %100, %125 : vector<8x128xf32>
      %133 = arith.addf %114, %129 : vector<8x128xf32>
      %134 = arith.minimumf %132, %133 : vector<8x128xf32>
      %135 = arith.subf %100, %125 : vector<8x128xf32>
      %136 = arith.subf %114, %129 : vector<8x128xf32>
      %137 = arith.maximumf %135, %136 : vector<8x128xf32>
      %138 = arith.subf %134, %137 : vector<8x128xf32>
      %cst_73 = arith.constant 0.000000e+00 : f32
      %139 = vector.broadcast %cst_73 : f32 to vector<8x128xf32>
      %140 = arith.maximumf %138, %139 : vector<8x128xf32>
      %141 = arith.addf %105, %127 : vector<8x128xf32>
      %142 = arith.addf %117, %131 : vector<8x128xf32>
      %143 = arith.minimumf %141, %142 : vector<8x128xf32>
      %144 = arith.subf %105, %127 : vector<8x128xf32>
      %145 = arith.subf %117, %131 : vector<8x128xf32>
      %146 = arith.maximumf %144, %145 : vector<8x128xf32>
      %147 = arith.subf %143, %146 : vector<8x128xf32>
      %cst_74 = arith.constant 0.000000e+00 : f32
      %148 = vector.broadcast %cst_74 : f32 to vector<8x128xf32>
      %149 = arith.maximumf %147, %148 : vector<8x128xf32>
      %150 = arith.mulf %140, %149 : vector<8x128xf32>
      %151 = arith.mulf %108, %111 : vector<8x128xf32>
      %152 = math.absf %151 : vector<8x128xf32>
      %153 = arith.mulf %120, %123 : vector<8x128xf32>
      %154 = math.absf %153 : vector<8x128xf32>
      %155 = arith.addf %152, %154 : vector<8x128xf32>
      %156 = arith.subf %155, %150 : vector<8x128xf32>
      %cst_75 = arith.constant 9.99999997E-7 : f32
      %157 = vector.broadcast %cst_75 : f32 to vector<8x128xf32>
      %158 = arith.addf %156, %157 : vector<8x128xf32>
      %159 = tpu.reciprocal %158 {approx = true} : vector<8x128xf32> -> vector<8x128xf32>
      %160 = arith.mulf %150, %159 : vector<8x128xf32>
      %161 = arith.subf %83, %160 : vector<8x128xf32>
      %c0_76 = arith.constant 0 : index
      %c2_77 = arith.constant 2 : index
      %c0_78 = arith.constant 0 : index
      %c0_79 = arith.constant 0 : index
      %162 = vector.load %arg5[%c0_76, %c2_77, %c0_78, %c0_79] : memref<1x6x8x128xf32, #tpu.memory_space<vmem>>, vector<1x1x8x128xf32>
      %163 = vector.shape_cast %162 : vector<1x1x8x128xf32> to vector<8x128xf32>
      %164 = arith.mulf %161, %161 : vector<8x128xf32>
      %cst_80 = arith.constant 0.000000e+00 : f32
      %165 = vector.broadcast %cst_80 : f32 to vector<8x128xf32>
      %166 = arith.select %31, %164, %165 : vector<8x128xi1>, vector<8x128xf32>
      %167 = arith.addf %163, %166 : vector<8x128xf32>
      %c0_81 = arith.constant 0 : index
      %c2_82 = arith.constant 2 : index
      %c0_83 = arith.constant 0 : index
      %c0_84 = arith.constant 0 : index
      %168 = vector.load %arg5[%c0_81, %c2_82, %c0_83, %c0_84] : memref<1x6x8x128xf32, #tpu.memory_space<vmem>>, vector<1x1x8x128xf32>
      %169 = vector.shape_cast %168 : vector<1x1x8x128xf32> to vector<8x128xf32>
      %170 = vector.shape_cast %167 : vector<8x128xf32> to vector<1x1x8x128xf32>
      tpu.vector_store %arg5[%c0_81, %c2_82, %c0_83, %c0_84], %170 {strides = array<i32>} : memref<1x6x8x128xf32, #tpu.memory_space<vmem>>, vector<1x1x8x128xf32>,
      %171 = arith.subf %100, %114 : vector<8x128xf32>
      %172 = arith.subf %105, %117 : vector<8x128xf32>
      %173 = vector.broadcast %8 : f32 to vector<8x128xf32>
      %174 = arith.mulf %120, %173 : vector<8x128xf32>
      %cst_85 = arith.constant 1.000000e-16 : f32
      %175 = vector.broadcast %cst_85 : f32 to vector<8x128xf32>
      %176 = arith.addf %175, %174 : vector<8x128xf32>
      %177 = math.log %176 : vector<8x128xf32>
      %178 = arith.subf %92, %177 : vector<8x128xf32>
      %179 = vector.broadcast %10 : f32 to vector<8x128xf32>
      %180 = arith.mulf %123, %179 : vector<8x128xf32>
      %cst_86 = arith.constant 1.000000e-16 : f32
      %181 = vector.broadcast %cst_86 : f32 to vector<8x128xf32>
      %182 = arith.addf %181, %180 : vector<8x128xf32>
      %183 = math.log %182 : vector<8x128xf32>
      %184 = arith.subf %95, %183 : vector<8x128xf32>
      %c0_87 = arith.constant 0 : index
      %c4_88 = arith.constant 4 : index
      %c0_89 = arith.constant 0 : index
      %c0_90 = arith.constant 0 : index
      %185 = vector.load %arg5[%c0_87, %c4_88, %c0_89, %c0_90] : memref<1x6x8x128xf32, #tpu.memory_space<vmem>>, vector<1x1x8x128xf32>
      %186 = vector.shape_cast %185 : vector<1x1x8x128xf32> to vector<8x128xf32>
      %187 = arith.mulf %171, %171 : vector<8x128xf32>
      %188 = arith.mulf %172, %172 : vector<8x128xf32>
      %189 = arith.addf %187, %188 : vector<8x128xf32>
      %190 = arith.mulf %178, %178 : vector<8x128xf32>
      %191 = arith.addf %189, %190 : vector<8x128xf32>
      %192 = arith.mulf %184, %184 : vector<8x128xf32>
      %193 = arith.addf %191, %192 : vector<8x128xf32>
      %cst_91 = arith.constant 0.000000e+00 : f32
      %194 = vector.broadcast %cst_91 : f32 to vector<8x128xf32>
      %195 = arith.select %31, %193, %194 : vector<8x128xi1>, vector<8x128xf32>
      %196 = arith.addf %186, %195 : vector<8x128xf32>
      %c0_92 = arith.constant 0 : index
      %c4_93 = arith.constant 4 : index
      %c0_94 = arith.constant 0 : index
      %c0_95 = arith.constant 0 : index
      %197 = vector.load %arg5[%c0_92, %c4_93, %c0_94, %c0_95] : memref<1x6x8x128xf32, #tpu.memory_space<vmem>>, vector<1x1x8x128xf32>
      %198 = vector.shape_cast %197 : vector<1x1x8x128xf32> to vector<8x128xf32>
      %199 = vector.shape_cast %196 : vector<8x128xf32> to vector<1x1x8x128xf32>
      tpu.vector_store %arg5[%c0_92, %c4_93, %c0_94, %c0_95], %199 {strides = array<i32>} : memref<1x6x8x128xf32, #tpu.memory_space<vmem>>, vector<1x1x8x128xf32>,
      %c0_96 = arith.constant 0 : index
      %c5 = arith.constant 5 : index
      %200 = arith.index_cast %17 : i32 to index
      %c0_97 = arith.constant 0 : index
      %201 = vector.load %arg3[%c0_96, %c5, %200, %c0_97] : memref<1x6x8x128xf32, #tpu.memory_space<vmem>>, vector<1x1x8x128xf32>
      %202 = vector.shape_cast %201 : vector<1x1x8x128xf32> to vector<8x128xf32>
      %203 = arith.fptosi %202 : vector<8x128xf32> to vector<8x128xi32>
      %c0_98 = arith.constant 0 : index
      %c5_99 = arith.constant 5 : index
      %204 = arith.index_cast %17 : i32 to index
      %c0_100 = arith.constant 0 : index
      %205 = vector.load %arg2[%c0_98, %c5_99, %204, %c0_100] : memref<1x9x8x128xf32, #tpu.memory_space<vmem>>, vector<1x1x8x128xf32>
      %206 = vector.shape_cast %205 : vector<1x1x8x128xf32> to vector<8x128xf32>
      %c0_101 = arith.constant 0 : index
      %c6 = arith.constant 6 : index
      %207 = arith.index_cast %17 : i32 to index
      %c0_102 = arith.constant 0 : index
      %208 = vector.load %arg2[%c0_101, %c6, %207, %c0_102] : memref<1x9x8x128xf32, #tpu.memory_space<vmem>>, vector<1x1x8x128xf32>
      %209 = vector.shape_cast %208 : vector<1x1x8x128xf32> to vector<8x128xf32>
      %210 = arith.maximumf %206, %209 : vector<8x128xf32>
      %c0_103 = arith.constant 0 : index
      %c7 = arith.constant 7 : index
      %211 = arith.index_cast %17 : i32 to index
      %c0_104 = arith.constant 0 : index
      %212 = vector.load %arg2[%c0_103, %c7, %211, %c0_104] : memref<1x9x8x128xf32, #tpu.memory_space<vmem>>, vector<1x1x8x128xf32>
      %213 = vector.shape_cast %212 : vector<1x1x8x128xf32> to vector<8x128xf32>
      %214 = arith.maximumf %210, %213 : vector<8x128xf32>
      %c0_105 = arith.constant 0 : index
      %c8 = arith.constant 8 : index
      %215 = arith.index_cast %17 : i32 to index
      %c0_106 = arith.constant 0 : index
      %216 = vector.load %arg2[%c0_105, %c8, %215, %c0_106] : memref<1x9x8x128xf32, #tpu.memory_space<vmem>>, vector<1x1x8x128xf32>
      %217 = vector.shape_cast %216 : vector<1x1x8x128xf32> to vector<8x128xf32>
      %218 = arith.maximumf %214, %217 : vector<8x128xf32>
      %cst_107 = arith.constant 0.000000e+00 : f32
      %219 = vector.broadcast %cst_107 : f32 to vector<8x128xf32>
      %cst_108 = arith.constant 0.000000e+00 : f32
      %220 = vector.broadcast %cst_108 : f32 to vector<8x128xf32>
      %c0_109 = arith.constant 0 : index
      %c5_110 = arith.constant 5 : index
      %221 = arith.index_cast %17 : i32 to index
      %c0_111 = arith.constant 0 : index
      %222 = vector.load %arg2[%c0_109, %c5_110, %221, %c0_111] : memref<1x9x8x128xf32, #tpu.memory_space<vmem>>, vector<1x1x8x128xf32>
      %223 = vector.shape_cast %222 : vector<1x1x8x128xf32> to vector<8x128xf32>
      %224 = arith.subf %223, %218 : vector<8x128xf32>
      %225 = math.exp %224 : vector<8x128xf32>
      %226 = arith.addf %219, %225 : vector<8x128xf32>
      %c0_i32_112 = arith.constant 0 : i32
      %227 = vector.broadcast %c0_i32_112 : i32 to vector<8x128xi32>
      %228 = arith.cmpi eq, %203, %227 : vector<8x128xi32>
      %cst_113 = arith.constant 0.000000e+00 : f32
      %229 = vector.broadcast %cst_113 : f32 to vector<8x128xf32>
      %230 = arith.select %228, %223, %229 : vector<8x128xi1>, vector<8x128xf32>
      %231 = arith.addf %220, %230 : vector<8x128xf32>
      %c0_114 = arith.constant 0 : index
      %c6_115 = arith.constant 6 : index
      %232 = arith.index_cast %17 : i32 to index
      %c0_116 = arith.constant 0 : index
      %233 = vector.load %arg2[%c0_114, %c6_115, %232, %c0_116] : memref<1x9x8x128xf32, #tpu.memory_space<vmem>>, vector<1x1x8x128xf32>
      %234 = vector.shape_cast %233 : vector<1x1x8x128xf32> to vector<8x128xf32>
      %235 = arith.subf %234, %218 : vector<8x128xf32>
      %236 = math.exp %235 : vector<8x128xf32>
      %237 = arith.addf %226, %236 : vector<8x128xf32>
      %c1_i32_117 = arith.constant 1 : i32
      %238 = vector.broadcast %c1_i32_117 : i32 to vector<8x128xi32>
      %239 = arith.cmpi eq, %203, %238 : vector<8x128xi32>
      %cst_118 = arith.constant 0.000000e+00 : f32
      %240 = vector.broadcast %cst_118 : f32 to vector<8x128xf32>
      %241 = arith.select %239, %234, %240 : vector<8x128xi1>, vector<8x128xf32>
      %242 = arith.addf %231, %241 : vector<8x128xf32>
      %c0_119 = arith.constant 0 : index
      %c7_120 = arith.constant 7 : index
      %243 = arith.index_cast %17 : i32 to index
      %c0_121 = arith.constant 0 : index
      %244 = vector.load %arg2[%c0_119, %c7_120, %243, %c0_121] : memref<1x9x8x128xf32, #tpu.memory_space<vmem>>, vector<1x1x8x128xf32>
      %245 = vector.shape_cast %244 : vector<1x1x8x128xf32> to vector<8x128xf32>
      %246 = arith.subf %245, %218 : vector<8x128xf32>
      %247 = math.exp %246 : vector<8x128xf32>
      %248 = arith.addf %237, %247 : vector<8x128xf32>
      %c2_i32 = arith.constant 2 : i32
      %249 = vector.broadcast %c2_i32 : i32 to vector<8x128xi32>
      %250 = arith.cmpi eq, %203, %249 : vector<8x128xi32>
      %cst_122 = arith.constant 0.000000e+00 : f32
      %251 = vector.broadcast %cst_122 : f32 to vector<8x128xf32>
      %252 = arith.select %250, %245, %251 : vector<8x128xi1>, vector<8x128xf32>
      %253 = arith.addf %242, %252 : vector<8x128xf32>
      %c0_123 = arith.constant 0 : index
      %c8_124 = arith.constant 8 : index
      %254 = arith.index_cast %17 : i32 to index
      %c0_125 = arith.constant 0 : index
      %255 = vector.load %arg2[%c0_123, %c8_124, %254, %c0_125] : memref<1x9x8x128xf32, #tpu.memory_space<vmem>>, vector<1x1x8x128xf32>
      %256 = vector.shape_cast %255 : vector<1x1x8x128xf32> to vector<8x128xf32>
      %257 = arith.subf %256, %218 : vector<8x128xf32>
      %258 = math.exp %257 : vector<8x128xf32>
      %259 = arith.addf %248, %258 : vector<8x128xf32>
      %c3_i32 = arith.constant 3 : i32
      %260 = vector.broadcast %c3_i32 : i32 to vector<8x128xi32>
      %261 = arith.cmpi eq, %203, %260 : vector<8x128xi32>
      %cst_126 = arith.constant 0.000000e+00 : f32
      %262 = vector.broadcast %cst_126 : f32 to vector<8x128xf32>
      %263 = arith.select %261, %256, %262 : vector<8x128xi1>, vector<8x128xf32>
      %264 = arith.addf %253, %263 : vector<8x128xf32>
      %265 = math.log %259 : vector<8x128xf32>
      %266 = arith.addf %218, %265 : vector<8x128xf32>
      %267 = arith.subf %266, %264 : vector<8x128xf32>
      %c0_127 = arith.constant 0 : index
      %c5_128 = arith.constant 5 : index
      %c0_129 = arith.constant 0 : index
      %c0_130 = arith.constant 0 : index
      %268 = vector.load %arg5[%c0_127, %c5_128, %c0_129, %c0_130] : memref<1x6x8x128xf32, #tpu.memory_space<vmem>>, vector<1x1x8x128xf32>
      %269 = vector.shape_cast %268 : vector<1x1x8x128xf32> to vector<8x128xf32>
      %cst_131 = arith.constant 0.000000e+00 : f32
      %270 = vector.broadcast %cst_131 : f32 to vector<8x128xf32>
      %271 = arith.select %31, %267, %270 : vector<8x128xi1>, vector<8x128xf32>
      %272 = arith.addf %269, %271 : vector<8x128xf32>
      %c0_132 = arith.constant 0 : index
      %c5_133 = arith.constant 5 : index
      %c0_134 = arith.constant 0 : index
      %c0_135 = arith.constant 0 : index
      %273 = vector.load %arg5[%c0_132, %c5_133, %c0_134, %c0_135] : memref<1x6x8x128xf32, #tpu.memory_space<vmem>>, vector<1x1x8x128xf32>
      %274 = vector.shape_cast %273 : vector<1x1x8x128xf32> to vector<8x128xf32>
      %275 = vector.shape_cast %272 : vector<8x128xf32> to vector<1x1x8x128xf32>
      tpu.vector_store %arg5[%c0_132, %c5_133, %c0_134, %c0_135], %275 {strides = array<i32>} : memref<1x6x8x128xf32, #tpu.memory_space<vmem>>, vector<1x1x8x128xf32>,
    } else {
    }
    %c1_i32_42 = arith.constant 1 : i32
    return
  }
  func.func @transform_0(%arg0: i32, %arg1: i32) -> (i32, i32, i32, i32) {
    %c0_i32 = arith.constant 0 : i32
    %c0_i32_0 = arith.constant 0 : i32
    %c0_i32_1 = arith.constant 0 : i32
    return %arg0, %c0_i32, %arg1, %c0_i32_0 : i32, i32, i32, i32
  }
  func.func @transform_1(%arg0: i32, %arg1: i32) -> (i32, i32, i32, i32) {
    %c0_i32 = arith.constant 0 : i32
    %c0_i32_0 = arith.constant 0 : i32
    %c0_i32_1 = arith.constant 0 : i32
    return %arg0, %c0_i32, %arg1, %c0_i32_0 : i32, i32, i32, i32
  }
  func.func @transform_2(%arg0: i32, %arg1: i32) -> (i32, i32) {
    %c0_i32 = arith.constant 0 : i32
    %c0_i32_0 = arith.constant 0 : i32
    %c0_i32_1 = arith.constant 0 : i32
    return %c0_i32, %c0_i32_0 : i32, i32
  }
  func.func @transform_3(%arg0: i32, %arg1: i32) -> (i32, i32, i32, i32) {
    %c0_i32 = arith.constant 0 : i32
    %c0_i32_0 = arith.constant 0 : i32
    %c0_i32_1 = arith.constant 0 : i32
    %c0_i32_2 = arith.constant 0 : i32
    return %arg0, %c0_i32, %c0_i32_0, %c0_i32_1 : i32, i32, i32, i32
  }
}

</mosaic_0001>

<bundles_post_ra>
// kernel: tpu_custom_call.1
= control target key start
LH: loop header
LB: loop body
LE: loop exit
PB: predicated region body
PF: predicated region fallthrough
CT: control target
= control target key end

     0   :  { %s1298_s0 = inlined_call_operand.hbm [shape: f32[3,9,8,128], index: 0, kind: input, shape index: {}]   ;;  %s1299_s1 = inlined_call_operand.hbm [shape: f32[3,6,8,128], index: 1, kind: input, shape index: {}]   ;;  %s1300_s2 = inlined_call_operand.hbm [shape: f32[3,4], index: 2, kind: input, shape index: {}]   ;;  %s1301_s3 = inlined_call_operand.hbm [shape: f32[3,6,8,128], index: 3, kind: output, shape index: {}]  }
   0x1   :  { %1304 = sst [smem:[#allocation16_spill]] %s1298_s0 }
   0x2   :  { %1305 = sst [smem:[#allocation17_spill]] %s1300_s2 }
   0x3   :  { %8 = vsyncpa [#allocation3], 0 }
   0x4   :  { %10 = vsyncpa [#allocation3 + $0x1], 0 }
   0x5   :  { %11 = vsyncpa [#allocation7], 0 }
   0x6   :  { %13 = vsyncpa [#allocation7 + $0x1], 0 }
   0x7   :  { %14 = vsyncpa [#allocation5], 0 }
   0x8   :  { %15 = vsyncpa [#allocation4], 0 }
   0x9   :  { %17 = vsyncpa [#allocation4 + $0x1], 0  ;;  %s1006_s12 = smov 0   ;;  %s1008_s13 = smov 0  }
   0xa   :  { %s1010_s14 = smov 0   ;;  %s1012_s15 = smov 0  }
   0xb   :  { %s1014_s16 = smov 0   ;;  %s1016_s17 = smov 0  }
   0xc LB: > { %s649_s18 = sadd.s32 4294967295, %s975_s17   ;;  %s650_s19 = sadd.s32 4294967294, %s975_s17   ;;  %s975_s17 = sphi %s1016_s17, %s23_s17   ;;  %s971_s16 = sphi %s1014_s16, %s1327_s16   ;;  %s967_s15 = sphi %s1012_s15, %s1326_s15   ;;  %s963_s14 = sphi %s1010_s14, %s1325_s14   ;;  %s959_s13 = sphi %s1008_s13, %s1324_s13   ;;  %s955_s12 = sphi %s1006_s12, %s1323_s12  }
   0xd   : > { %s44_s20 = sadd.s32 1, %s963_s14  ;;  %p51_p0 = scmp.ne.s32.totalorder %s963_s14, %s959_s13 }
   0xe   : > { %p52_p1 = scmp.eq.s32.totalorder %s975_s17, 0  ;;  %p57_p2 = scmp.ne.s32.totalorder %s959_s13, %s955_s12 }
   0xf   : > { %p1044_p3 = scmp.eq.s32.totalorder %s649_s18, 0  ;;  %p130_p4 = scmp.eq.s32.totalorder %s649_s18, 2 }
  0x10   : > { %p53_p5 = por %p52_p1, %p51_p0  ;;  %p136_p6 = scmp.eq.s32.totalorder %s650_s19, 2 }
  0x11   : > { %p1050_p7 = por %p1044_p3, %p57_p2  ;;  %p1054_p8 = por %p130_p4, %p51_p0 }
  0x12   : > { %p1058_p9 = por %p136_p6, %p57_p2  ;;  %p651_p10 = scmp.ge.s32.totalorder %s975_s17, 1 }
  0x13   : > { %p143_p11 = scmp.lt.s32.totalorder %s975_s17, 4  ;;  %p727_p13 = scmp.lt.s32.totalorder %s975_s17, 3 }
  0x14   : > { %s1309_s24 = scalar_select %p1058_p9, 1, 0 }
  0x15   : > { %p1064_p12 = pnand %p651_p10, %p143_p11  ;;  %s1070_s26 = sand.u32 1, %s963_s14  }
  0x16   : > { %1310 = sst [smem:[#allocation14_spill]] %s1309_s24  ;;  %p1074_p1 = pnand %p727_p13, %p53_p5 }
  0x17   : > { %p711_p0 = pneg %p1064_p12  ;;  %s35_s28 = sadd.s32 1, %s971_s16 }
  0x18   : > { %s690_s29 = smul.u32 72, %s1070_s26  ;;  %p37_p4 = scmp.ge.s32.totalorder %s35_s28, 3 }
  0x19   : > { %p712_p2 = pnand %p711_p0, %p1044_p3  ;;  %s977_s30 = smov [#allocation8]  }
  0x1a   : > { %s1313_s2 = sld [smem:[#allocation17_spill]]  ;;  %s1329_s28 = smov (%p37_p4, %s35_s28), 0 }
  0x1b   : > { %1314 = sst [smem:[#allocation15_spill]] %s1329_s28  ;;  %s691_s6 = smul.u32 1152, %s971_s16 }
  0x1c   : > { %s39_s7 = ssub.s32 %s971_s16, %s1329_s28  ;;  %s169_s8 = scalar_lea.vmem [#allocation2], %s690_s29 }
  0x1d   : > { %s177_s9 = sshll.u32 %s169_s8, 4  ;;  %p42_p5 = scmp.eq.s32.totalorder %s39_s7, 0  ;;  %s178_s9 = int_to_ptr.vmem [resolvable:$true] %s177_s9 }
  0x1e   : > { %s1315_s0 = sld [smem:[#allocation16_spill]]  ;;  %s166_s24 = scalar_lea.sflag [#allocation3], %s1070_s26 }
  0x1f   : > { %s1096_s19 = scalar_select %p42_p5, %s963_s14, %s44_s20  }
  0x20   : > { %714 = dma.hbm_to_smem (!%p712_p2), %s1313_s2, 64, %s977_s30, [#allocation5]  }
  0x21   : > { %p833_p6 = pneg %p1074_p1  ;;  %s844_s30 = scalar_lea.vmem %s178_s9, 1152 }
  0x22   : > { %p845_p10 = scmp.ne.s32.totalorder %s178_s9, %s844_s30  ;;  %s978_s29 = smov [#allocation2]  }
  0x23   : > { %s849_s4 = sshll.u32 %s978_s29, 4  ;;  %s850_s4 = int_to_ptr.vmem [resolvable:$false] %s849_s4 }
  0x24   : > { %s176_s18 = scalar_lea.hbm %s1315_s0, %s691_s6  ;;  %p847_p11 = pnand %p845_p10, %p833_p6 }
  0x25   : > { %s851_s5 = scalar_lea.vmem %s850_s4, 2304  ;;  %p852_p0 = scmp.lt.s32.totalorder %s178_s9, %s850_s4 }
  0x26   : > { %p848_p13 = pneg %p847_p11  ;;  %p853_p2 = scmp.lt.s32.totalorder %s851_s5, %s844_s30 }
  0x28   : > { %p854_p4 = por %p853_p2, %p852_p0 }
  0x2a   : > { %p855_p9 = pnand %p854_p4, %p848_p13 }
  0x2c   : > { %858 = shalt.err (!%p855_p9)
}
  0x2d   : > { %s979_s20 = smov 128   ;;  %s980_s6 = smov 8  }
  0x2e   : > { %718 = dma.hbm_to_vmem [thread:$0]  (!%p1074_p1), %s176_s18, 1152, %s178_s9, %s166_s24, %s979_s20, %s979_s20, %s980_s6  }
  0x2f   : > { %s692_s7 = smul.u32 48, %s1070_s26  ;;  %s188_s5 = scalar_lea.sflag [#allocation7], %s1070_s26 }
  0x30   : > { %s693_s8 = smul.u32 768, %s971_s16  ;;  %s981_s2 = smov [#allocation6]  }
  0x31   : > { %s191_s4 = scalar_lea.vmem [#allocation6], %s692_s7  ;;  %s877_s28 = sshll.u32 %s981_s2, 4  ;;  %s878_s28 = int_to_ptr.vmem [resolvable:$false] %s877_s28 }
  0x32   : > { %s198_s29 = scalar_lea.hbm %s1299_s1, %s693_s8  ;;  %s199_s30 = sshll.u32 %s191_s4, 4  ;;  %s200_s30 = int_to_ptr.vmem [resolvable:$true] %s199_s30 }
  0x33   : > { %s872_s0 = scalar_lea.vmem %s200_s30, 768  ;;  %s879_s24 = scalar_lea.vmem %s878_s28, 1536 }
  0x34   : > { %p873_p9 = scmp.ne.s32.totalorder %s200_s30, %s872_s0  ;;  %p880_p11 = scmp.lt.s32.totalorder %s200_s30, %s878_s28 }
  0x35   : > { %p881_p13 = scmp.lt.s32.totalorder %s879_s24, %s872_s0 }
  0x36   : > { %p875_p5 = pnand %p873_p9, %p833_p6 }
  0x37   : > { %p882_p0 = por %p881_p13, %p880_p11 }
  0x38   : > { %p876_p10 = pneg %p875_p5 }
  0x3a   : > { %p883_p2 = pnand %p882_p0, %p876_p10 }
  0x3c   : > { %886 = shalt.err (!%p883_p2)
}
  0x3d   : > { %721 = dma.hbm_to_vmem [thread:$0]  (!%p1074_p1), %s198_s29, 768, %s200_s30, %s188_s5, %s979_s20, %s979_s20, %s980_s6  }
  0x3e   : > { %211 = sbr.rel (%p1064_p12) target bundleno = 385 (0x181), region = 32  ;;  %s1120_s26 = sand.u32 (!%p1064_p12), 1, %s959_s13  }
  0x3f   : > { %s694_s2 = smul.u32 (!%p1064_p12), 72, %s1120_s26  ;;  %s214_s9 = scalar_lea.sflag (!%p1064_p12), [#allocation3], %s1120_s26 }
  0x41   : > { %s1124_s18 = scalar_lea.vmem (!%p1064_p12), [#allocation2], %s694_s2 }
  0x43   : > { %938 = dma.done.wait (%p1050_p7), %s214_s9, 1152  }
  0x44   : > { %940 = vsyncadd (%p1050_p7), %s214_s9, 4294966144  ;;  %s695_s0 = smul.u32 48, %s1120_s26  ;;  %s223_s25 = scalar_lea.sflag [#allocation7], %s1120_s26 }
  0x46   : > { %s1132_s27 = scalar_lea.vmem [#allocation6], %s695_s0 }
  0x47   : > { %942 = dma.done.wait (%p1050_p7), %s223_s25, 768  }
  0x48   : > { %944 = vsyncadd (%p1050_p7), %s223_s25, 4294966528 }
  0x49   : > { %946 = dma.done.wait (%p1044_p3), [#allocation5], 64  }
  0x4a   : > { %948 = vsyncadd (%p1044_p3), [#allocation5], 4294967232 }
  0x4b   : > { %235 = sfence }
  0x4c   : > { %s658_s28 = sshll.u32 %s967_s15, 7  ;;  %v277_v0 = vlaneseq  ;;  %v1144_v1 = vld [vmem:[%s1124_s18] sm:$0xff]  ;;  %s1146_s20 = scalar_lea.vmem [#allocation9], %s695_s0  ;;  %v982_v2 = vmov 0.0   ;;  %v288_v6 = vld [vmem:[%s1132_s27] sm:$0xff] }
  0x4d   : > { %265 = vst [vmem:[%s1146_s20 + $0x10] sm:$0xff] %v982_v2  ;;  %267 = vst [vmem:[%s1146_s20 + $0x20] sm:$0xff] %v982_v2  ;;  %s1151_s22 = sld [smem:[#allocation8 + %s658_s28]]  ;;  %s271_s21 = sadd.s32 1, %s658_s28  ;;  %v295_v5 = vand.u32 2147483647, %v1144_v1 }
  0x4e   : > { %268 = vst [vmem:[%s1146_s20 + $0x28] sm:$0xff] %v982_v2  ;;  %s1153_s6 = sld [smem:[#allocation8 + %s271_s21]]  ;;  %s273_s7 = sadd.s32 2, %s658_s28  ;;  %v278_v3 = vshrl.u32 %v277_v0, 7  ;;  %v280_v4 = vand.u32 127, %v277_v0  ;;  %vm289_vm0 = vcmp.eq.f32.partialorder %v288_v6, 1.0 }
  0x4f   : > { %s1156_s8 = sld [smem:[#allocation8 + %s273_s7]]  ;;  %s275_s10 = sadd.s32 3, %s658_s28  ;;  %v296_v8 = vsub.f32 0.0, %v295_v5  ;;  %vm291_vm1 = vcmp.eq.f32.partialorder %v288_v6, 0.0  ;;  %v294_v22 = vmax.f32 %v1144_v1, 0.0 }
  0x50   : > { %s1159_s11 = sld [smem:[#allocation8 + %s275_s10]]  ;;  %v285_v7 = vmul.u32 128, %v278_v3 }
  0x51   : > { %v297_v10 = vmul.f32 1.442695, %v296_v8 }
  0x52   : > { %v286_v9 = vadd.s32 %v285_v7, %v280_v4 }
  0x53   : > { %784 = vpow2.f32 %v297_v10 }
  0x54   : > { %vm287_vm2 = vcmp.lt.s32.totalorder %v286_v9, 128 }
  0x55   : > { %vm1161_vm3 = vmand %vm289_vm0, %vm287_vm2 }
  0x56   : > { %vm1165_vm4 = vmand %vm291_vm1, %vm287_vm2  ;;  %v663_v13 = vsel %vm1161_vm3, 1.0, %v982_v2 }
  0x57   : > { %v660_v14 = vsel %vm1165_vm4, 1.0, %v982_v2  ;;  %325 = vadd.xlane.f32.xlu0 %v663_v13  ;;  %664 = vst [vmem:[%s1146_s20 + $0x18] sm:$0xff] %v663_v13 }
  0x58   : > { %661 = vst [vmem:[%s1146_s20 + $0x8] sm:$0xff] %v660_v14 }
  0x60   : > { %v785_v15 = vpop.eup %784 }
  0x61   : > { %v299_v16 = vadd.f32 1.0, %v785_v15  ;;  %v302_v17 = vmul.f32 -0.5, %v785_v15  ;;  %v305_v19 = vand.u32 2147483647, %v785_v15 }
  0x63   : > { %786 = vlog2.f32 %v299_v16  ;;  %v303_v18 = vadd.f32 1.0, %v302_v17  ;;  %vm306_vm5 = vcmp.lt.f32.partialorder %v305_v19, 0.0004427343 }
  0x65   : > { %v304_v20 = vmul.f32 %v785_v15, %v303_v18 }
  0x70   : > { %v787_v21 = vpop.eup %786 }
  0x71   : > { %v301_v23 = vmul.f32 0.6931472, %v787_v21 }
  0x73   : > { %v307_v24 = vsel %vm306_vm5, %v304_v20, %v301_v23 }
  0x74   : > { %v308_v25 = vadd.f32 %v307_v24, %v294_v22 }
  0x76   : > { %v310_v26 = vsel %vm1165_vm4, %v308_v25, 0.0 }
  0x77   : > { %312 = vst [vmem:[%s1146_s20] sm:$0xff] %v310_v26 }
  0xe0   : > { %v326_v27 = vpop.xlane.xlu0 %325 }
  0xe1   : > { %v327_v28 = vrot.slane %v326_v27, 4 }
  0xe3   : > { %v328_v29 = vadd.f32 %v327_v28, %v326_v27 }
  0xe5   : > { %v329_v30 = vrot.slane %v328_v29, 2 }
  0xe7   : > { %v330_v31 = vadd.f32 %v329_v30, %v328_v29 }
  0xe9   : > { %v331_v32 = vrot.slane %v330_v31, 1 }
  0xeb   : > { %v332_v33 = vadd.f32 %v331_v32, %v330_v31 }
  0xed   : > { %696 = vpush %v332_v33 }
 0x11e   : > { %s697_s29 = spop %696 }
 0x11f   : > { %p334_p3 = scmp.gt.f32.partialorder %s697_s29, 0.0 }
 0x120   : > { %v666_v34 = vld [vmem:[%s1124_s18 + $0x8] sm:$0xff] (%p334_p3)  ;;  %v667_v35 = vld [vmem:[%s1124_s18 + $0x10] sm:$0xff] (%p334_p3)  ;;  %v423_v38 = vstv (%p334_p3), %s1156_s8  ;;  %v1183_v39 = vld [vmem:[%s1124_s18 + $0x18] sm:$0xff] (%p334_p3)  ;;  %v665_v9 = vmul.f32 (%p334_p3), -1.442695, %v1144_v1 }
 0x121   : > { %337 = sbr.rel (!%p334_p3) target bundleno = 360 (0x168), region = 52  ;;  %v670_v36 = vmul.f32 (%p334_p3), -1.442695, %v666_v34  ;;  %v671_v37 = vmul.f32 (%p334_p3), -1.442695, %v667_v35  ;;  %v1186_v40 = vld [vmem:[%s1124_s18 + $0x20] sm:$0xff] (%p334_p3)  ;;  %v429_v42 = vstv (%p334_p3), %s1159_s11  ;;  %v370_v7 = vstv (%p334_p3), %s1151_s22 }
 0x122   : > { %v674_v41 = vld [vmem:[%s1132_s27 + $0x18] sm:$0xff] (%p334_p3)  ;;  %v368_v46 = vmul.f32 (%p334_p3), 1.442695, %v1183_v39  ;;  %v675_v47 = vld [vmem:[%s1132_s27 + $0x20] sm:$0xff] (%p334_p3)  ;;  %v372_v48 = vmul.f32 (%p334_p3), 1.442695, %v1186_v40  ;;  %v374_v10 = vstv (%p334_p3), %s1153_s6 }
 0x123   : > { %788 = vpow2.f32 (%p334_p3), %v670_v36  ;;  %v424_v43 = vmul.f32 (%p334_p3), %v674_v41, %v423_v38  ;;  %v1191_v44 = vld [vmem:[%s1124_s18 + $0x28] sm:$0xff] (%p334_p3)  ;;  %v1194_v45 = vld [vmem:[%s1124_s18 + $0x30] sm:$0xff] (%p334_p3)  ;;  %v430_v49 = vmul.f32 (%p334_p3), %v675_v47, %v429_v42  ;;  %v1200_v50 = vld [vmem:[%s1124_s18 + $0x38] sm:$0xff] (%p334_p3)  ;;  %v386_v16 = vmul.f32 (%p334_p3), 0.5, %v674_v41 }
 0x124   : > { %790 = vpow2.f32 (%p334_p3), %v671_v37  ;;  %v456_v51 = vmax.f32 (%p334_p3), %v1191_v44, %v1194_v45  ;;  %v1205_v53 = vld [vmem:[%s1124_s18 + $0x40] sm:$0xff] (%p334_p3)  ;;  %v387_v17 = vmul.f32 (%p334_p3), 0.5, %v675_v47  ;;  %v407_v20 = vmul.f32 (%p334_p3), %v675_v47, %v674_v41 }
 0x125   : > { %v425_v52 = vadd.f32 (%p334_p3), 1e-16, %v424_v43  ;;  %792 = vpow2.f32 (%p334_p3), %v368_v46  ;;  %v431_v55 = vadd.f32 (%p334_p3), 1e-16, %v430_v49  ;;  %v672_v18 = vld [vmem:[%s1132_s27 + $0x8] sm:$0xff] (%p334_p3)  ;;  %v673_v19 = vld [vmem:[%s1132_s27 + $0x10] sm:$0xff] (%p334_p3) }
 0x126   : > { %v460_v54 = vmax.f32 %v456_v51, %v1200_v50  ;;  %794 = vpow2.f32 %v372_v48  ;;  %v680_v24 = vld [vmem:[%s1132_s27 + $0x28] sm:$0xff]  ;;  %v389_v27 = vadd.f32 %v672_v18, %v386_v16  ;;  %v392_v28 = vsub.f32 %v672_v18, %v386_v16 }
 0x127   : > { %796 = vlog2.f32 %v425_v52  ;;  %v397_v29 = vadd.f32 %v673_v19, %v387_v17  ;;  %v400_v31 = vsub.f32 %v673_v19, %v387_v17  ;;  %v408_v32 = vand.u32 2147483647, %v407_v20 }
 0x128   : > { %v1209_v56 = vmax.f32 %v460_v54, %v1205_v53  ;;  %798 = vlog2.f32 %v431_v55  ;;  %v698_v34 = vtrunc.f32 %v680_v24 }
 0x12a   : > { %v465_v57 = vsub.f32 %v1191_v44, %v1209_v56  ;;  %v472_v58 = vsub.f32 %v1194_v45, %v1209_v56  ;;  %v479_v59 = vsub.f32 %v1200_v50, %v1209_v56  ;;  %v486_v61 = vsub.f32 %v1205_v53, %v1209_v56 }
 0x12c   : > { %v466_v60 = vmul.f32 1.442695, %v465_v57  ;;  %v473_v2 = vmul.f32 1.442695, %v472_v58  ;;  %v480_v4 = vmul.f32 1.442695, %v479_v59 }
 0x12d   : > { %v487_v5 = vmul.f32 1.442695, %v486_v61 }
 0x12e   : > { %800 = vpow2.f32 %v466_v60 }
 0x130   : > { %v789_v62 = vpop.eup %788 }
 0x131   : > { %v791_v63 = vpop.eup %790  ;;  %v359_v0 = vadd.f32 1.0, %v789_v62  ;;  %v699_v62 = vcvt.f32.s32 %v698_v34 }
 0x132   : > { %v365_v3 = vadd.f32 1.0, %v791_v63  ;;  %v793_v6 = vpop.eup %792 }
 0x133   : > { %802 = vrcp.f32 %v359_v0  ;;  %v795_v8 = vpop.eup %794  ;;  %v371_v13 = vmul.f32 %v793_v6, %v370_v7  ;;  %vm469_vm6 = vcmp.eq.s32.totalorder %v699_v62, 0  ;;  %vm476_vm7 = vcmp.eq.s32.totalorder %v699_v62, 1 }
 0x134   : > { %804 = vrcp.f32 %v365_v3  ;;  %v797_v12 = vpop.eup %796  ;;  %v375_v14 = vmul.f32 %v795_v8, %v374_v10  ;;  %v678_v10 = vld [vmem:[%s1146_s20 + $0x20] sm:$0xff]  ;;  %v470_v16 = vsel %vm469_vm6, %v1191_v44, 0.0  ;;  %v477_v17 = vsel %vm476_vm7, %v1194_v45, 0.0 }
 0x135   : > { %806 = vpow2.f32 %v473_v2  ;;  %v799_v15 = vpop.eup %798  ;;  %v427_v21 = vmul.f32 0.6931472, %v797_v12  ;;  %v384_v22 = vmul.f32 0.5, %v371_v13  ;;  %vm483_vm8 = vcmp.eq.s32.totalorder %v699_v62, 2 }
 0x136   : > { %808 = vpow2.f32 %v480_v4  ;;  %v405_v23 = vmul.f32 %v375_v14, %v371_v13  ;;  %v385_v25 = vmul.f32 0.5, %v375_v14  ;;  %v433_v26 = vmul.f32 0.6931472, %v799_v15 }
 0x137   : > { %810 = vpow2.f32 %v487_v5  ;;  %v428_v33 = vsub.f32 %v1183_v39, %v427_v21  ;;  %v478_v20 = vadd.f32 %v477_v17, %v470_v16  ;;  %v484_v21 = vsel %vm483_vm8, %v1200_v50, 0.0 }
 0x138   : > { %812 = vpow2.f32 %v665_v9  ;;  %v406_v38 = vand.u32 2147483647, %v405_v23  ;;  %v434_v48 = vsub.f32 %v1186_v40, %v433_v26  ;;  %vm490_vm9 = vcmp.eq.s32.totalorder %v699_v62, 3 }
 0x139   : > { %v440_v60 = vmul.f32 %v428_v33, %v428_v33  ;;  %v491_v23 = vsel %vm490_vm9, %v1205_v53, 0.0 }
 0x13a   : > { %v442_v3 = vmul.f32 %v434_v48, %v434_v48  ;;  %v409_v7 = vadd.f32 %v408_v32, %v406_v38  ;;  %v676_v32 = vld [vmem:[%s1146_s20 + $0x10] sm:$0xff] }
 0x13b   : > { %v801_v1 = vpop.eup %800 }
 0x140   : > { %v803_v30 = vpop.eup %802 }
 0x141   : > { %v805_v35 = vpop.eup %804  ;;  %v388_v36 = vadd.f32 %v803_v30, %v384_v22  ;;  %v391_v37 = vsub.f32 %v803_v30, %v384_v22  ;;  %v421_v41 = vsub.f32 %v803_v30, %v672_v18  ;;  %v485_v22 = vadd.f32 %v484_v21, %v478_v20 }
 0x142   : > { %v807_v42 = vpop.eup %806  ;;  %v396_v43 = vadd.f32 %v805_v35, %v385_v25  ;;  %v399_v46 = vsub.f32 %v805_v35, %v385_v25  ;;  %v422_v47 = vsub.f32 %v805_v35, %v673_v19 }
 0x143   : > { %v809_v49 = vpop.eup %808  ;;  %v390_v51 = vmin.f32 %v388_v36, %v389_v27  ;;  %v393_v52 = vmax.f32 %v391_v37, %v392_v28  ;;  %v437_v54 = vmul.f32 %v421_v41, %v421_v41  ;;  %v475_v55 = vadd.f32 %v807_v42, %v801_v1  ;;  %v685_v1 = vld [vmem:[%s1146_s20 + $0x28] sm:$0xff] }
 0x144   : > { %v811_v57 = vpop.eup %810  ;;  %v398_v58 = vmin.f32 %v396_v43, %v397_v29  ;;  %v401_v39 = vmax.f32 %v399_v46, %v400_v31  ;;  %v438_v59 = vmul.f32 %v422_v47, %v422_v47  ;;  %v492_v44 = vadd.f32 %v491_v23, %v485_v22 }
 0x145   : > { %v394_v61 = vsub.f32 %v390_v51, %v393_v52  ;;  %v482_v63 = vadd.f32 %v809_v49, %v475_v55  ;;  %v813_v40 = vpop.eup %812 }
 0x146   : > { %v402_v0 = vsub.f32 %v398_v58, %v401_v39  ;;  %v439_v2 = vadd.f32 %v438_v59, %v437_v54  ;;  %v341_v13 = vadd.f32 1.0, %v813_v40 }
 0x147   : > { %v395_v4 = vmax.f32 %v394_v61, 0.0  ;;  %v489_v5 = vadd.f32 %v811_v57, %v482_v63 }
 0x148   : > { %v403_v6 = vmax.f32 %v402_v0, 0.0  ;;  %v441_v8 = vadd.f32 %v440_v60, %v439_v2 }
 0x149   : > { %814 = vlog2.f32 %v489_v5 }
 0x14a   : > { %v404_v9 = vmul.f32 %v403_v6, %v395_v4  ;;  %v443_v12 = vadd.f32 %v442_v3, %v441_v8  ;;  %816 = vrcp.f32 %v341_v13 }
 0x14c   : > { %v410_v14 = vsub.f32 %v409_v7, %v404_v9  ;;  %v444_v15 = vsel %vm1161_vm3, %v443_v12, 0.0 }
 0x14d   : > { %v445_v18 = vadd.f32 %v678_v10, %v444_v15 }
 0x14e   : > { %v411_v19 = vadd.f32 1e-06, %v410_v14 }
 0x14f   : > { %679 = vst [vmem:[%s1146_s20 + $0x20] sm:$0xff] %v445_v18 }
 0x150   : > { %818 = vrcp.f32 %v411_v19 }
 0x156   : > { %v815_v24 = vpop.eup %814 }
 0x157   : > { %v494_v45 = vmul.f32 0.6931472, %v815_v24  ;;  %v817_v27 = vpop.eup %816 }
 0x159   : > { %v495_v25 = vadd.f32 %v494_v45, %v1209_v56 }
 0x15b   : > { %v496_v26 = vsub.f32 %v495_v25, %v492_v44 }
 0x15d   : > { %v819_v28 = vpop.eup %818  ;;  %v499_v29 = vsel %vm1161_vm3, %v496_v26, 0.0 }
 0x15e   : > { %v413_v50 = vmul.f32 %v819_v28, %v404_v9  ;;  %v500_v30 = vadd.f32 %v685_v1, %v499_v29 }
 0x160   : > { %v414_v31 = vsub.f32 %v817_v27, %v413_v50  ;;  %686 = vst [vmem:[%s1146_s20 + $0x28] sm:$0xff] %v500_v30 }
 0x162   : > { %v417_v33 = vmul.f32 %v414_v31, %v414_v31 }
 0x164   : > { %v418_v53 = vsel %vm1161_vm3, %v417_v33, 0.0 }
 0x165   : > { %v419_v34 = vadd.f32 %v676_v32, %v418_v53 }
 0x167   : > { %677 = vst [vmem:[%s1146_s20 + $0x10] sm:$0xff] %v419_v34 }
 0x168 PF: > { %s700_s4 = smul.u32 768, %s967_s15  ;;  %s516_s30 = sshll.u32 %s1146_s20, 4  ;;  %s1251_s30 = int_to_ptr.vmem [resolvable:$true] %s516_s30 }
 0x169   : > { %s503_s9 = scalar_lea.sflag [#allocation4], %s1120_s26  ;;  %s887_s18 = scalar_lea.vmem %s1251_s30, 768 }
 0x16a   : > { %s1249_s2 = scalar_lea.hbm %s1301_s3, %s700_s4  ;;  %p888_p7 = scmp.ne.s32.totalorder %s1251_s30, %s887_s18 }
 0x16b   : > { %s983_s0 = smov [#allocation9]  }
 0x16c   : > { %p889_p12 = pnand %p888_p7, %p1054_p8  ;;  %s891_s25 = sshll.u32 %s983_s0, 4  ;;  %s892_s25 = int_to_ptr.vmem [resolvable:$false] %s891_s25 }
 0x16d   : > { %s893_s15 = scalar_lea.vmem %s892_s25, 1536  ;;  %p894_p6 = scmp.lt.s32.totalorder %s1251_s30, %s892_s25 }
 0x16e   : > { %p890_p1 = pneg %p889_p12  ;;  %p895_p4 = scmp.lt.s32.totalorder %s893_s15, %s887_s18 }
 0x170   : > { %p896_p9 = por %p895_p4, %p894_p6 }
 0x172   : > { %p897_p5 = pnand %p896_p9, %p890_p1 }
 0x174   : > { %900 = shalt.err (!%p897_p5)
}
 0x175   : > { %s901_s27 = scalar_lea.hbm %s1249_s2, 768  ;;  %s905_s22 = scalar_lea.hbm %s1301_s3, 2304 }
 0x176   : > { %p902_p10 = scmp.ne.s32.totalorder %s1249_s2, %s901_s27  ;;  %p906_p0 = scmp.lt.s32.totalorder %s1249_s2, %s1301_s3 }
 0x177   : > { %p907_p2 = scmp.lt.s32.totalorder %s905_s22, %s901_s27 }
 0x178   : > { %p903_p11 = pnand %p902_p10, %p1054_p8 }
 0x179   : > { %p908_p3 = por %p907_p2, %p906_p0 }
 0x17a   : > { %p904_p13 = pneg %p903_p11 }
 0x17c   : > { %p909_p7 = pnand %p908_p3, %p904_p13 }
 0x17e   : > { %912 = shalt.err (!%p909_p7)
}
 0x17f   : > { %s984_s7 = smov 128   ;;  %s985_s8 = smov 8  }
 0x180   : > { %709 = dma.vmem_to_hbm [thread:$0]  (%p1054_p8), %s1251_s30, 768, %s1249_s2, %s503_s9, %s984_s7, %s984_s7, %s985_s8  }
 0x181 PF: > { %s1320_s10 = sld [smem:[#allocation14_spill]]  ;;  %p729_p12 = scmp.ge.s32.totalorder %s975_s17, 2 }
 0x182   : > { %s531_s11 = sand.u32 1, %s955_s12  }
 0x183   : > { %s532_s29 = scalar_lea.sflag [#allocation4], %s531_s11 }
 0x187   : > { %p1321_p1 = scmp.ne.s32.totalorder %s1320_s10, 0 }
 0x189   : > { %p723_p6 = pnand %p729_p12, %p1321_p1 }
 0x18b   : > { %p724_p4 = pneg %p723_p6 }
 0x18d   : > { %950 = dma.done.wait (%p724_p4), %s532_s29, 768  }
 0x18e   : > { %952 = vsyncadd (%p724_p4), %s532_s29, 4294966528  ;;  %s23_s17 = sadd.s32 1, %s975_s17   ;;  %s1322_s23 = sld [smem:[#allocation15_spill]] }
 0x18f   : > { %p20_p9 = scmp.ge.s32.totalorder %s23_s17, 5   ;;  %s1323_s12 = smov %s959_s13 }
 0x190   : > { %s1324_s13 = smov %s963_s14  ;;  %s1325_s14 = smov %s1096_s19 }
 0x191   : > { %s1326_s15 = smov %s971_s16  ;;  %22 = sbr.rel (!%p20_p9) target bundleno = 12 (0xc), region = 121 }
 0x194   : > { %s1327_s16 = smov %s1322_s23 }
 0x196   :  { %537 = vsyncpa [#allocation3], 1 }
 0x197   :  { %539 = vsyncpa [#allocation3 + $0x1], 1 }
 0x198   :  { %540 = vsyncpa [#allocation7], 1 }
 0x199   :  { %542 = vsyncpa [#allocation7 + $0x1], 1 }
 0x19a   :  { %543 = vsyncpa [#allocation4], 1 }
 0x19b   :  { %545 = vsyncpa [#allocation4 + $0x1], 1 }
 0x19c   :  { %546 = vsyncpa [#allocation5], 1 }
 0x19d   :  { %548 = vsyncpa [#allocation5 + $0x1], 1 }

</bundles_post_ra>
